<compile_context>
chip_gen: v6e
topology: v6e:2x2x1
jax: 0.10.0
libtpu: 0.0.40
codegen_flags: <defaults>
</compile_context>

<pallas_src>
import jax
import jax.numpy as jnp
from jax import lax
from jax.experimental import pallas as pl
from jax.experimental.pallas import tpu as pltpu

EPS = 1e-5


def _fused_conv_bn_relu_kernel(slab_ref, w_ref, gb_ref, out_ref):
    # slab_ref: (N, K, HW)      bf16 im2col columns (shared by all grid steps)
    # w_ref   : (1, Cg, K)      bf16 conv weights for this channel group
    # gb_ref  : (1, Cg, 2)      f32  [..., 0] = gamma, [..., 1] = beta
    # out_ref : (N, 1, Cg, HW)  f32  lane-dense output block for this group
    N, K, HW = slab_ref.shape
    total = N * HW

    # Form the (K, N*HW) column matrix with an in-VMEM lane concat (this is the
    # transpose that used to be a separate XLA op through HBM).
    cols = jnp.concatenate([slab_ref[n] for n in range(N)], axis=1)   # (K, N*HW) bf16

    # Single MXU dot: bf16 x bf16 -> f32 accumulate.
    conv = lax.dot_general(
        w_ref[0], cols,
        dimension_numbers=(((1,), (0,)), ((), ())),
        preferred_element_type=jnp.float32)                           # (Cg, N*HW) f32

    # Training-mode BatchNorm: per-channel batch stats, biased variance,
    # two-pass (mean, then centered variance), all in f32.
    mean = jnp.sum(conv, axis=1, keepdims=True) * (1.0 / total)       # (Cg, 1)
    centered = conv - mean
    var = jnp.sum(centered * centered, axis=1, keepdims=True) * (1.0 / total)
    inv = lax.rsqrt(var + EPS)                                        # (Cg, 1)

    gamma = gb_ref[0, :, 0:1]                                         # (Cg, 1)
    beta = gb_ref[0, :, 1:2]                                          # (Cg, 1)
    y = jnp.maximum(centered * (inv * gamma) + beta, 0.0)             # (Cg, N*HW)

    # Lane-dense stores: HW is a multiple of 128, so slices are 128-aligned.
    for n in range(N):
        out_ref[n, 0] = y[:, n * HW:(n + 1) * HW]


def double_conv2(x_nchw, w_oihw, gamma, beta):
    """Forward pass of DoubleConv2. x_nchw: (N, Cin, H, W) -> (N, Cout, H, W)."""
    N, Cin, H, W = x_nchw.shape
    Cout = w_oihw.shape[0]
    HW = H * W
    K = Cin * 9
    assert HW % 128 == 0, "TODO(synk): pad H*W up to a multiple of 128 for lane-dense stores"

    # Channel-group grid: 2 independent steps so v7x megacore has parallel work.
    G = 2 if (Cout % 2 == 0 and Cout >= 2) else 1
    Cg = Cout // G

    # im2col slab kept image-major (N, K, HW): no HBM transpose; bf16 halves bytes.
    # slab[n, ci*9 + kh*3 + kw, h*W + w] = xpad[n, ci, h+kh, w+kw]
    xb = x_nchw.astype(jnp.bfloat16)
    xpad = jnp.pad(xb, ((0, 0), (0, 0), (1, 1), (1, 1)))
    taps = [xpad[:, :, dh:dh + H, dw:dw + W]
            for dh in range(3) for dw in range(3)]
    slab = jnp.stack(taps, axis=2).reshape(N, K, HW)                  # (N, Cin*9, HW) bf16

    # OIHW -> (G, Cg, Cin*9); contraction index order (ci, kh, kw) matches slab.
    wmat = w_oihw.reshape(G, Cg, K).astype(jnp.bfloat16)
    # gamma/beta packed into a single (G, Cg, 2) f32 input (one DMA, not two).
    gb = jnp.stack([gamma.astype(jnp.float32), beta.astype(jnp.float32)],
                   axis=-1).reshape(G, Cg, 2)

    slab_bytes = N * K * HW * 2
    out_bytes = N * Cout * HW * 4
    cost = pl.CostEstimate(
        flops=2 * Cout * K * N * HW,
        transcendentals=Cout,                      # one rsqrt per channel
        bytes_accessed=G * slab_bytes + wmat.size * 2 + gb.size * 4 + out_bytes)

    out = pl.pallas_call(
        _fused_conv_bn_relu_kernel,
        out_shape=jax.ShapeDtypeStruct((N, G, Cg, HW), jnp.float32),
        grid=(G,),
        in_specs=[
            pl.BlockSpec((N, K, HW), lambda j: (0, 0, 0)),    # shared across steps
            pl.BlockSpec((1, Cg, K), lambda j: (j, 0, 0)),
            pl.BlockSpec((1, Cg, 2), lambda j: (j, 0, 0)),
        ],
        out_specs=pl.BlockSpec((N, 1, Cg, HW), lambda j: (0, j, 0, 0)),
        compiler_params=pltpu.CompilerParams(
            dimension_semantics=("parallel",),
            # Explicit VMEM budget: working set is tiny and stays far below the
            # v7x 64 MiB physical / 32 MiB scoped default.
            vmem_limit_bytes=32 * 1024 * 1024),
        cost_estimate=cost,
    )(slab, wmat, gb)

    # (N, G, Cg, HW) -> (N, Cout, H, W): contiguous reshape, already NCHW.
    return out.reshape(N, Cout, H, W)


def _reference(x_nchw, w_oihw, gamma, beta):
    conv = lax.conv_general_dilated(
        x_nchw.astype(jnp.float32), w_oihw.astype(jnp.float32),
        window_strides=(1, 1), padding="SAME",
        dimension_numbers=("NCHW", "OIHW", "NCHW"))
    mean = conv.mean(axis=(0, 2, 3), keepdims=True)
    var = conv.var(axis=(0, 2, 3), keepdims=True)   # biased, like PyTorch BN training
    y = (conv - mean) * lax.rsqrt(var + EPS)
    y = y * gamma.reshape(1, -1, 1, 1) + beta.reshape(1, -1, 1, 1)
    return jnp.maximum(y, 0.0)


if __name__ == "__main__":
    # Small shapes consistent with the module: in_channels=4, out_channels=8.
    N, Cin, Cout, H, W = 2, 4, 8, 16, 16

    key = jax.random.PRNGKey(0)
    kx, kw = jax.random.split(key)
    x = jax.random.normal(kx, (N, Cin, H, W), dtype=jnp.float32)

    # Deterministic parameter init (kaiming-uniform-ish for conv weight).
    fan_in = Cin * 3 * 3
    bound = 1.0 / (fan_in ** 0.5)
    w = jax.random.uniform(kw, (Cout, Cin, 3, 3), dtype=jnp.float32,
                           minval=-bound, maxval=bound)
    gamma = jnp.ones((Cout,), jnp.float32)   # BatchNorm default weight
    beta = jnp.zeros((Cout,), jnp.float32)   # BatchNorm default bias

    out = jax.block_until_ready(double_conv2(x, w, gamma, beta))
    ref = jax.block_until_ready(_reference(x, w, gamma, beta))

    assert out.shape == (N, Cout, H, W), out.shape
    # bf16 MXU operands with f32 accumulation: tolerance relaxed vs pure-f32.
    assert jnp.allclose(out, ref, atol=5e-2, rtol=5e-2), float(
        jnp.max(jnp.abs(out - ref)))

    print("KERNEL_OK")
</pallas_src>

<mosaic_0001>
module attributes {stable_mosaic.version = 11 : i64} {
  func.func @_fused_conv_bn_relu_kernel(%arg0: i32, %arg1: memref<2x36x256xbf16, #tpu.memory_space<vmem>>, %arg2: memref<1x4x36xbf16, #tpu.memory_space<vmem>>, %arg3: memref<1x4x2xf32, #tpu.memory_space<vmem>>, %arg4: memref<2x1x4x256xf32, #tpu.memory_space<vmem>>) attributes {dimension_semantics = [#tpu.dimension_semantics<parallel>], iteration_bounds = array<i64: 2>, scalar_prefetch = 0 : i64, scratch_operands = 0 : i64, tpu.core_type = #tpu.core_type<tc>, window_params = [{pipeline_mode = #tpu.pipeline_mode<synchronous>, transform_indices = @transform_0, window_bounds = array<i64: 2, 36, 256>}, {transform_indices = @transform_1, window_bounds = array<i64: 1, 4, 36>}, {transform_indices = @transform_2, window_bounds = array<i64: 1, 4, 2>}, {transform_indices = @transform_3, window_bounds = array<i64: 2, 1, 4, 256>}]} {
    %c0 = arith.constant 0 : index
    %c0_0 = arith.constant 0 : index
    %c0_1 = arith.constant 0 : index
    %0 = vector.load %arg1[%c0, %c0_0, %c0_1] : memref<2x36x256xbf16, #tpu.memory_space<vmem>>, vector<1x36x256xbf16>
    %1 = vector.shape_cast %0 : vector<1x36x256xbf16> to vector<36x256xbf16>
    %c1 = arith.constant 1 : index
    %c0_2 = arith.constant 0 : index
    %c0_3 = arith.constant 0 : index
    %2 = vector.load %arg1[%c1, %c0_2, %c0_3] : memref<2x36x256xbf16, #tpu.memory_space<vmem>>, vector<1x36x256xbf16>
    %3 = vector.shape_cast %2 : vector<1x36x256xbf16> to vector<36x256xbf16>
    %4 = tpu.concatenate %1, %3 in 1 : vector<36x256xbf16>, vector<36x256xbf16> -> vector<36x512xbf16>
    %c0_4 = arith.constant 0 : index
    %c0_5 = arith.constant 0 : index
    %c0_6 = arith.constant 0 : index
    %5 = vector.load %arg2[%c0_4, %c0_5, %c0_6] : memref<1x4x36xbf16, #tpu.memory_space<vmem>>, vector<1x4x36xbf16>
    %6 = vector.shape_cast %5 : vector<1x4x36xbf16> to vector<4x36xbf16>
    %cst = arith.constant dense<0.000000e+00> : vector<4x512xf32>
    %7 = tpu.matmul %6, %4, %cst {dimension_numbers = #tpu.dot_dimension_numbers<[1], [0], [0], [1], [0, 0, 1, 1], [], []>} : vector<4x36xbf16>, vector<36x512xbf16>, vector<4x512xf32> -> vector<4x512xf32>
    %cst_7 = arith.constant dense<0.000000e+00> : vector<4xf32>
    %8 = vector.multi_reduction <add>, %7, %cst_7 [1] : vector<4x512xf32> to vector<4xf32>
    %9 = vector.shape_cast %8 : vector<4xf32> to vector<4x1xf32>
    %cst_8 = arith.constant 0.001953125 : f32
    %10 = vector.broadcast %cst_8 : f32 to vector<4x1xf32>
    %11 = arith.mulf %9, %10 : vector<4x1xf32>
    %12 = vector.broadcast %11 : vector<4x1xf32> to vector<4x512xf32>
    %13 = arith.subf %7, %12 : vector<4x512xf32>
    %14 = arith.mulf %13, %13 : vector<4x512xf32>
    %cst_9 = arith.constant dense<0.000000e+00> : vector<4xf32>
    %15 = vector.multi_reduction <add>, %14, %cst_9 [1] : vector<4x512xf32> to vector<4xf32>
    %16 = vector.shape_cast %15 : vector<4xf32> to vector<4x1xf32>
    %cst_10 = arith.constant 0.001953125 : f32
    %17 = vector.broadcast %cst_10 : f32 to vector<4x1xf32>
    %18 = arith.mulf %16, %17 : vector<4x1xf32>
    %cst_11 = arith.constant 9.99999974E-6 : f32
    %19 = vector.broadcast %cst_11 : f32 to vector<4x1xf32>
    %20 = arith.addf %18, %19 : vector<4x1xf32>
    %21 = math.rsqrt %20 : vector<4x1xf32>
    %c0_12 = arith.constant 0 : index
    %c0_13 = arith.constant 0 : index
    %c0_14 = arith.constant 0 : index
    %22 = vector.load %arg3[%c0_12, %c0_13, %c0_14] : memref<1x4x2xf32, #tpu.memory_space<vmem>>, vector<1x4x1xf32>
    %23 = vector.shape_cast %22 : vector<1x4x1xf32> to vector<4x1xf32>
    %c0_15 = arith.constant 0 : index
    %c0_16 = arith.constant 0 : index
    %c1_17 = arith.constant 1 : index
    %24 = vector.load %arg3[%c0_15, %c0_16, %c1_17] : memref<1x4x2xf32, #tpu.memory_space<vmem>>, vector<1x4x1xf32>
    %25 = vector.shape_cast %24 : vector<1x4x1xf32> to vector<4x1xf32>
    %26 = arith.mulf %21, %23 : vector<4x1xf32>
    %27 = vector.broadcast %26 : vector<4x1xf32> to vector<4x512xf32>
    %28 = arith.mulf %13, %27 : vector<4x512xf32>
    %29 = vector.broadcast %25 : vector<4x1xf32> to vector<4x512xf32>
    %30 = arith.addf %28, %29 : vector<4x512xf32>
    %cst_18 = arith.constant 0.000000e+00 : f32
    %31 = vector.broadcast %cst_18 : f32 to vector<4x512xf32>
    %32 = arith.maximumf %30, %31 : vector<4x512xf32>
    %33 = vector.extract_strided_slice %32 {offsets = [0, 0], sizes = [4, 256], strides = [1, 1]} : vector<4x512xf32> to vector<4x256xf32>
    %c0_19 = arith.constant 0 : index
    %c0_20 = arith.constant 0 : index
    %c0_21 = arith.constant 0 : index
    %c0_22 = arith.constant 0 : index
    %34 = vector.load %arg4[%c0_19, %c0_20, %c0_21, %c0_22] : memref<2x1x4x256xf32, #tpu.memory_space<vmem>>, vector<1x1x4x256xf32>
    %35 = vector.shape_cast %34 : vector<1x1x4x256xf32> to vector<4x256xf32>
    %36 = vector.shape_cast %33 : vector<4x256xf32> to vector<1x1x4x256xf32>
    tpu.vector_store %arg4[%c0_19, %c0_20, %c0_21, %c0_22], %36 {strides = array<i32>} : memref<2x1x4x256xf32, #tpu.memory_space<vmem>>, vector<1x1x4x256xf32>,
    %37 = vector.extract_strided_slice %32 {offsets = [0, 256], sizes = [4, 256], strides = [1, 1]} : vector<4x512xf32> to vector<4x256xf32>
    %c1_23 = arith.constant 1 : index
    %c0_24 = arith.constant 0 : index
    %c0_25 = arith.constant 0 : index
    %c0_26 = arith.constant 0 : index
    %38 = vector.load %arg4[%c1_23, %c0_24, %c0_25, %c0_26] : memref<2x1x4x256xf32, #tpu.memory_space<vmem>>, vector<1x1x4x256xf32>
    %39 = vector.shape_cast %38 : vector<1x1x4x256xf32> to vector<4x256xf32>
    %40 = vector.shape_cast %37 : vector<4x256xf32> to vector<1x1x4x256xf32>
    tpu.vector_store %arg4[%c1_23, %c0_24, %c0_25, %c0_26], %40 {strides = array<i32>} : memref<2x1x4x256xf32, #tpu.memory_space<vmem>>, vector<1x1x4x256xf32>,
    return
  }
  func.func @transform_0(%arg0: i32) -> (i32, i32, i32) {
    %c0_i32 = arith.constant 0 : i32
    %c0_i32_0 = arith.constant 0 : i32
    %c0_i32_1 = arith.constant 0 : i32
    %c0_i32_2 = arith.constant 0 : i32
    return %c0_i32, %c0_i32_0, %c0_i32_1 : i32, i32, i32
  }
  func.func @transform_1(%arg0: i32) -> (i32, i32, i32) {
    %c0_i32 = arith.constant 0 : i32
    %c0_i32_0 = arith.constant 0 : i32
    %c0_i32_1 = arith.constant 0 : i32
    return %arg0, %c0_i32, %c0_i32_0 : i32, i32, i32
  }
  func.func @transform_2(%arg0: i32) -> (i32, i32, i32) {
    %c0_i32 = arith.constant 0 : i32
    %c0_i32_0 = arith.constant 0 : i32
    %c0_i32_1 = arith.constant 0 : i32
    return %arg0, %c0_i32, %c0_i32_0 : i32, i32, i32
  }
  func.func @transform_3(%arg0: i32) -> (i32, i32, i32, i32) {
    %c0_i32 = arith.constant 0 : i32
    %c0_i32_0 = arith.constant 0 : i32
    %c0_i32_1 = arith.constant 0 : i32
    %c0_i32_2 = arith.constant 0 : i32
    return %c0_i32, %arg0, %c0_i32_0, %c0_i32_1 : i32, i32, i32, i32
  }
}

</mosaic_0001>

<bundles_post_ra>
// kernel: tpu_custom_call.1
= control target key start
LH: loop header
LB: loop body
LE: loop exit
PB: predicated region body
PF: predicated region fallthrough
CT: control target
= control target key end

     0   :  { %8 = vsyncpa [#allocation3], 0  ;;  %s834_s0 = inlined_call_operand.vmem [shape: bf16[2,36,256], index: 0, kind: input, shape index: {}]   ;;  %s835_s1 = inlined_call_operand.vmem [shape: bf16[2,4,36], index: 1, kind: input, shape index: {}]   ;;  %s836_s2 = inlined_call_operand.vmem [shape: f32[2,4,2], index: 2, kind: input, shape index: {}]   ;;  %s837_s3 = inlined_call_operand.hbm [shape: f32[2,2,4,256], index: 3, kind: output, shape index: {}]  }
   0x1   :  { %10 = vsyncpa [#allocation3 + $0x1], 0  ;;  %s687_s12 = smov 0   ;;  %s689_s13 = smov 0  }
   0x2   :  { %s691_s14 = smov 0   ;;  %s693_s15 = smov 0  }
   0x3 LB: > { %s708_s16 = sadd.s32 4294967295, %s659_s15   ;;  %s499_s17 = sadd.s32 4294967294, %s659_s15   ;;  %s659_s15 = sphi %s693_s15, %s843_s15   ;;  %s655_s14 = sphi %s691_s14, %s842_s14   ;;  %s651_s13 = sphi %s689_s13, %s841_s13   ;;  %s647_s12 = sphi %s687_s12, %s840_s12  }
   0x4   : > { %s712_s18 = sadd.s32 1, %s659_s15   ;;  %s96_s19 = sadd.s32 1, %s655_s14 }
   0x5   : > { %s93_s20 = ssub.s32 %s659_s15, %s712_s18  ;;  %p106_p0 = scmp.ne.s32.totalorder %s655_s14, %s651_s13 }
   0x6   : > { %p94_p1 = scmp.eq.s32.totalorder %s93_s20, 0  ;;  %p107_p2 = scmp.eq.s32.totalorder %s708_s16, 1 }
   0x7   : > { %p112_p3 = scmp.ne.s32.totalorder %s651_s13, %s647_s12  ;;  %p113_p4 = scmp.eq.s32.totalorder %s499_s17, 1 }
   0x8   : > { %s723_s21 = scalar_select %p94_p1, %s655_s14, %s96_s19  }
   0x9   : > { %p725_p5 = por %p107_p2, %p106_p0  ;;  %p729_p6 = por %p113_p4, %p112_p3 }
   0xa   : > { %p502_p7 = scmp.ge.s32.totalorder %s659_s15, 1  ;;  %p148_p8 = scmp.lt.s32.totalorder %s659_s15, 3 }
   0xc   : > { %p149_p9 = pnand %p502_p7, %p148_p8 }
   0xd   : > { %p175_p10 = scmp.lt.s32.totalorder (!%p149_p9), %s708_s16, 1  ;;  %s172_s8 = sand.u32 (!%p149_p9), 1, %s651_s13  }
   0xe   : > { %152 = sbr.rel (%p149_p9) target bundleno = 695 (0x2b7), region = 32  ;;  %s503_s10 = sshll.u32 (!%p149_p9), %s172_s8, 4 }
   0xf   : > { %s533_s17 = sshll.u32 (!%p149_p9), %s708_s16, 7  ;;  %s794_s25 = scalar_lea.sflag (!%p149_p9), [#allocation3], %s172_s8 }
  0x10   : > { %s792_s24 = scalar_lea.hbm (!%p149_p9), %s837_s3, %s533_s17  ;;  %s663_s26 = smov (!%p149_p9), [#allocation2]  }
  0x11   : > { %s603_s27 = sshll.u32 (!%p149_p9), %s663_s26, 4  ;;  %s604_s27 = int_to_ptr.vmem [resolvable:$false] %s603_s27 }
  0x12   : > { %s605_s28 = scalar_lea.vmem (!%p149_p9), %s604_s27, 512 }
  0x13   : > { %v188_v0 = vld [vmem:[%s834_s0 + $0x20] sm:$0x33]  ;;  %vm250_vm0 = vcmask 1041408   ;;  %v510_v1 = vld [vmem:[%s834_s0 + $0x48] sm:$0x33]  ;;  %s755_s9 = scalar_select %p175_p10, %s708_s16, 1 }
  0x14   : > { %v516_v2 = vcombine.high %v188_v0, %v188_v0  ;;  %v522_v3 = vcombine.high %v510_v1, %v510_v1  ;;  %v515_v4 = vcombine.low %v188_v0, %v188_v0  ;;  %v521_v5 = vcombine.low %v510_v1, %v510_v1  ;;  %v585_v6 = vld [vmem:[%s834_s0 + $0x14] ss:$8 sps:$4 sm:$0xff]   ;;  %v589_v8 = vld [vmem:[%s834_s0 + $0x10] ss:$8 sps:$4 sm:$0xff]   ;;  %v591_v12 = vld [vmem:[%s834_s0 + $0x4] ss:$8 sps:$4 sm:$0xff]  }
  0x15   : > { %v587_v7 = vld [vmem:[%s834_s0 + $0x3c] ss:$8 sps:$4 sm:$0xff]   ;;  %v590_v11 = vld [vmem:[%s834_s0 + $0x38] ss:$8 sps:$4 sm:$0xff]   ;;  %v593_v13 = vld [vmem:[%s834_s0 + $0x2c] ss:$8 sps:$4 sm:$0xff]  }
  0x16   : > { %523 = vmatprep.subr.msk.bf16.mxu0 %vm250_vm0, %v516_v2  ;;  %525 = vmatprep.subr.msk.bf16.mxu1 %vm250_vm0, %v522_v3  ;;  %v252_v9 = vsel %vm250_vm0, %v515_v4, 0  ;;  %v258_v10 = vsel %vm250_vm0, %v521_v5, 0  ;;  %v661_v14 = vmov 0   ;;  %s504_s20 = sshll.u32 %s755_s9, 1  ;;  %v595_v15 = vld [vmem:[%s834_s0] ss:$8 sps:$4 sm:$0xff]  }
  0x17   : > { %274 = vmatpush1.bf16.msra.mxu0 %v252_v9  ;;  %315 = vmatpush1.bf16.msra.mxu1 %v258_v10  ;;  %v596_v16 = vld [vmem:[%s834_s0 + $0x28] ss:$8 sps:$4 sm:$0xff]   ;;  %s178_s30 = scalar_lea.vmem %s835_s1, %s504_s20  ;;  %vm246_vm1 = vcmask 293888   ;;  %vm345_vm2 = vcmask 1043456   ;;  %v662_v50 = vmov 1   ;;  %s505_s4 = sshll.u32 %s755_s9, 2 }
  0x18   : > { %275 = vmatprep.subr.bf16.mxu0 %v585_v6  ;;  %316 = vmatprep.subr.bf16.mxu1 %v587_v7  ;;  %v245_v17 = vld [vmem:[%s178_s30] sm:$0x3]  ;;  %s182_s7 = scalar_lea.vmem %s836_s2, %s505_s4  ;;  %s174_s9 = scalar_lea.vmem [#allocation2], %s503_s10 }
  0x19   : > { %295 = vmatprep.mubr.bf16.mxu0 %v661_v14  ;;  %336 = vmatprep.mubr.bf16.mxu1 %v661_v14  ;;  %v376_v54 = vld [vmem:[%s182_s7] sm:$0xf]  ;;  %s425_s11 = sshll.u32 %s174_s9, 4  ;;  %s787_s11 = int_to_ptr.vmem [resolvable:$true] %s425_s11 }
  0x1a   : > { %578 = vset.pattern.permute.xlu1 %v661_v14  ;;  %580 = vset.pattern.permute.xlu0 %v662_v50  ;;  %s599_s16 = scalar_lea.vmem %s787_s11, 256  ;;  %p606_p0 = scmp.lt.s32.totalorder %s787_s11, %s604_s27 }
  0x1b   : > { %276 = vmatpush1.bf16.msra.mxu0 %v589_v8  ;;  %317 = vmatpush1.bf16.msra.mxu1 %v590_v11  ;;  %p600_p11 = scmp.ne.s32.totalorder %s787_s11, %s599_s16  ;;  %p607_p1 = scmp.lt.s32.totalorder %s605_s28, %s599_s16 }
  0x1c   : > { %277 = vmatprep.subr.bf16.mxu0 %v591_v12  ;;  %318 = vmatprep.subr.bf16.mxu1 %v593_v13 }
  0x1d   : > { %p601_p12 = pnand %p600_p11, %p725_p5  ;;  %p608_p2 = por %p607_p1, %p606_p0 }
  0x1f   : > { %278 = vmatpush1.bf16.msra.mxu0 %v595_v15  ;;  %319 = vmatpush1.bf16.msra.mxu1 %v596_v16  ;;  %p602_p13 = pneg %p601_p12 }
  0x21   : > { %p609_p3 = pnand %p608_p2, %p602_p13 }
  0x22   : > { %524 = vmatmul.mubr.msk.bf16.vlgmr.msra.gmra.mxu0 %vm246_vm1, %v245_v17  ;;  %526 = vmatmul.mubr.msk.bf16.vlgmr.msra.gmra.mxu1 %vm246_vm1, %v245_v17 }
  0xe2   : > { %v297_v18 = vpop.f32.mrf.mxu0  ;;  %v338_v19 = vpop.f32.mrf.mxu1 }
  0xe3   : > { %v346_v22 = vsel %vm345_vm2, %v297_v18, 0.0  ;;  %v349_v23 = vsel %vm345_vm2, %v338_v19, 0.0 }
  0xe4   : > { %v299_v20 = vpop.f32.mrf.mxu0  ;;  %v340_v21 = vpop.f32.mrf.mxu1 }
  0xe5   : > { %v347_v24 = vsel %vm345_vm2, %v299_v20, 0.0  ;;  %v351_v31 = vsel %vm345_vm2, %v340_v21, 0.0 }
  0xe6   : > { %v348_v25 = vadd.f32 %v347_v24, %v346_v22  ;;  %v301_v26 = vpop.f32.mrf.mxu0  ;;  %v342_v27 = vpop.f32.mrf.mxu1 }
  0xe8   : > { %v302_v28 = vpop.f32.mrf.mxu0  ;;  %v343_v29 = vpop.f32.mrf.mxu1  ;;  %v350_v30 = vadd.f32 %v349_v23, %v348_v25 }
  0xea   : > { %v352_v32 = vadd.f32 %v351_v31, %v350_v30 }
  0xec   : > { %353 = vadd.xlane.f32.xlu0 %v352_v32 }
 0x175   : > { %v354_v33 = vpop.xlane.xlu0 %353 }
 0x176   : > { %v355_v34 = vmul.f32 0.001953125, %v354_v33 }
 0x178   : > { %v356_v35 = vsub.f32 %v297_v18, %v355_v34  ;;  %v357_v36 = vsub.f32 %v299_v20, %v355_v34  ;;  %v358_v37 = vsub.f32 %v338_v19, %v355_v34  ;;  %v359_v38 = vsub.f32 %v340_v21, %v355_v34 }
 0x17a   : > { %v360_v39 = vmul.f32 %v356_v35, %v356_v35  ;;  %v361_v40 = vmul.f32 %v357_v36, %v357_v36  ;;  %v362_v41 = vmul.f32 %v358_v37, %v358_v37  ;;  %v363_v42 = vmul.f32 %v359_v38, %v359_v38 }
 0x17c   : > { %v364_v43 = vsel %vm345_vm2, %v360_v39, 0.0  ;;  %v365_v44 = vsel %vm345_vm2, %v361_v40, 0.0  ;;  %v367_v46 = vsel %vm345_vm2, %v362_v41, 0.0  ;;  %v369_v48 = vsel %vm345_vm2, %v363_v42, 0.0 }
 0x17d   : > { %v366_v45 = vadd.f32 %v365_v44, %v364_v43 }
 0x17f   : > { %v368_v47 = vadd.f32 %v367_v46, %v366_v45 }
 0x181   : > { %v370_v49 = vadd.f32 %v369_v48, %v368_v47 }
 0x183   : > { %371 = vadd.xlane.f32.xlu0 %v370_v49 }
 0x20c   : > { %v372_v51 = vpop.xlane.xlu0 %371 }
 0x20d   : > { %v373_v52 = vmul.f32 0.001953125, %v372_v51 }
 0x20f   : > { %v374_v53 = vadd.f32 1e-05, %v373_v52 }
 0x211   : > { %597 = vrsqrt.f32 %v374_v53 }
 0x21e   : > { %v598_v55 = vpop.eup %597 }
 0x21f   : > { %v377_v56 = vmul.f32 %v598_v55, %v376_v54 }
 0x221   : > { %380 = vperm.xlu1 %578, %v377_v56  }
 0x225   : > { %579 = vset.pattern.permute.xlu1 %v662_v50 }
 0x226   : > { %389 = vperm.xlu1 %579, %v376_v54  }
 0x29c   : > { %v381_v57 = vpop.permute.xlu1 %380 }
 0x29d   : > { %v383_v58 = vmul.f32 %v381_v57, %v356_v35  ;;  %v384_v59 = vmul.f32 %v381_v57, %v357_v36  ;;  %v385_v60 = vmul.f32 %v381_v57, %v358_v37  ;;  %v386_v61 = vmul.f32 %v381_v57, %v359_v38 }
 0x2a1   : > { %v390_v62 = vpop.permute.xlu1 %389 }
 0x2a2   : > { %v392_v63 = vadd.f32 %v390_v62, %v383_v58  ;;  %v393_v0 = vadd.f32 %v390_v62, %v384_v59  ;;  %v394_v1 = vadd.f32 %v390_v62, %v385_v60  ;;  %v395_v2 = vadd.f32 %v390_v62, %v386_v61 }
 0x2a4   : > { %v396_v3 = vmax.f32 %v392_v63, 0.0  ;;  %v397_v4 = vmax.f32 %v393_v0, 0.0  ;;  %v398_v5 = vmax.f32 %v394_v1, 0.0  ;;  %v399_v6 = vmax.f32 %v395_v2, 0.0 }
 0x2a6   : > { %v402_v7 = vcombine.low %v396_v3, %v397_v4  ;;  %v407_v8 = vcombine.low %v398_v5, %v399_v6 }
 0x2a8   : > { %404 = vst [vmem:[%s174_s9] sm:$0xff] %v402_v7  ;;  %527 = vst [vmem:[%s174_s9 + $0x8] sm:$0xff] %v407_v8 }
 0x2a9   : > { %612 = shalt.err (!%p609_p3)
}
 0x2aa   : > { %s613_s29 = scalar_lea.hbm %s792_s24, 256  ;;  %s617_s5 = scalar_lea.hbm %s837_s3, 512 }
 0x2ab   : > { %p614_p4 = scmp.ne.s32.totalorder %s792_s24, %s613_s29  ;;  %p618_p9 = scmp.lt.s32.totalorder %s792_s24, %s837_s3 }
 0x2ac   : > { %p619_p10 = scmp.lt.s32.totalorder %s617_s5, %s613_s29 }
 0x2ad   : > { %p615_p7 = pnand %p614_p4, %p725_p5 }
 0x2ae   : > { %p620_p11 = por %p619_p10, %p618_p9 }
 0x2af   : > { %p616_p8 = pneg %p615_p7 }
 0x2b1   : > { %p621_p12 = pnand %p620_p11, %p616_p8 }
 0x2b3   : > { %624 = shalt.err (!%p621_p12)
}
 0x2b4   : > { %s664_s8 = smov 128   ;;  %s665_s10 = smov 256  }
 0x2b5   : > { %s666_s9 = smov 8  }
 0x2b6   : > { %534 = dma.vmem_to_hbm [thread:$0]  (%p725_p5), %s787_s11, 256, %s792_s24, %s794_s25, %s664_s8, %s665_s10, %s666_s9  }
 0x2b7 PF: > { %p540_p13 = scmp.ge.s32.totalorder %s659_s15, 2  ;;  %s440_s17 = sand.u32 1, %s647_s12  }
 0x2b8   : > { %s441_s19 = scalar_lea.sflag [#allocation3], %s440_s17 }
 0x2b9   : > { %p537_p0 = pnand %p540_p13, %p729_p6 }
 0x2bb   : > { %p538_p1 = pneg %p537_p0 }
 0x2bd   : > { %642 = dma.done.wait (%p538_p1), %s441_s19, 256  }
 0x2be   : > { %644 = vsyncadd (%p538_p1), %s441_s19, 4294967040  ;;  %p13_p2 = scmp.ge.s32.totalorder %s712_s18, 4   ;;  %s840_s12 = smov %s651_s13 }
 0x2bf   : > { %s841_s13 = smov %s655_s14  ;;  %s842_s14 = smov %s723_s21 }
 0x2c0   : > { %s843_s15 = smov %s712_s18  ;;  %15 = sbr.rel (!%p13_p2) target bundleno = 3 (0x3), region = 72 }
 0x2c5   :  { %446 = vsyncpa [#allocation3], 1 }
 0x2c6   :  { %448 = vsyncpa [#allocation3 + $0x1], 1 }

</bundles_post_ra>
